<compile_context>
chip_gen: v5e
topology: v5e:2x2
jax: 0.10.0
libtpu: 0.0.40
codegen_flags: <defaults>
</compile_context>

<pallas_src>
import jax
import jax.numpy as jnp
from jax.experimental import pallas as pl
from jax.experimental.pallas import tpu as pltpu


def _round_up(v, m):
    return ((v + m - 1) // m) * m


def _prepost_kernel(x_ref, w_ref, b_ref, o_ref):
    # x_ref: (tn, D)   raw flattened NCHW input tile (f32 or bf16)
    # w_ref: (D, Kp)   bf16 weight with normalization folded in (cols >= K are 0)
    # b_ref: (1, Kp)   f32 folded bias; padded class columns hold -1e30
    # o_ref: (tn, Kp)  softmax probabilities (padded cols are exactly 0)
    x_bf16 = x_ref[...].astype(jnp.bfloat16)
    logit = jnp.dot(x_bf16, w_ref[...],
                    preferred_element_type=jnp.float32) + b_ref[...]
    m = jnp.max(logit, axis=-1, keepdims=True)      # row-local stable softmax
    e = jnp.exp(logit - m)
    denom = jnp.sum(e, axis=-1, keepdims=True)
    o_ref[...] = (e / denom).astype(o_ref.dtype)    # exact divide, off crit path


def make_add_pre_post(weight, bias, mean, std, image_hw, *,
                      tile_n=512, out_dtype=jnp.float32):
    """One-time setup: fold (mean, std) into (weight, bias), pad classes to a
    lane-dense multiple of 128, and return a jitted forward(x_nchw)->(N, K)."""
    H, W = image_hw
    hw = H * W
    D, K = weight.shape
    C = len(mean)
    assert D == C * hw, "weight rows must equal C*H*W"
    tile_n = max(8, _round_up(int(tile_n), 8))

    # ---- one-time constant fold: normalization -> linear layer ------------
    #   ((x - m) * s) @ W + b  ==  x @ (s[:,None] * W) + (b - (m*s) @ W)
    mean_flat = jnp.repeat(jnp.asarray(mean, jnp.float32), hw)            # (D,)
    invstd_flat = 1.0 / jnp.repeat(jnp.asarray(std, jnp.float32), hw)     # (D,)
    w32 = weight.astype(jnp.float32)
    w_folded = invstd_flat[:, None] * w32                                 # (D, K)
    b_folded = bias.astype(jnp.float32) - (mean_flat * invstd_flat) @ w32 # (K,)

    # ---- pad classes to lane-dense Kp (multiple of 128) --------------------
    # Padded weight columns stay exactly zero so -1e30 bias => softmax weight 0.
    Kp = max(128, _round_up(K, 128))
    w_pad = jnp.zeros((D, Kp), jnp.bfloat16).at[:, :K].set(
        w_folded.astype(jnp.bfloat16))
    b_pad = jnp.full((1, Kp), jnp.float32(-1e30)).at[0, :K].set(b_folded)
    w_pad, b_pad = jax.block_until_ready((w_pad, b_pad))  # materialize once

    out_itemsize = jnp.dtype(out_dtype).itemsize

    @jax.jit
    def forward(x_nchw):
        N = x_nchw.shape[0]
        assert x_nchw.shape[1:] == (C, H, W)
        x_flat = x_nchw.reshape(N, D)
        x_itemsize = jnp.dtype(x_nchw.dtype).itemsize

        # Batch tile: as big as tile_n, but small enough that the grid has
        # >= 2 steps (so "parallel" shards across v7x's two TensorCores).
        tn = min(tile_n, _round_up(pl.cdiv(N, 2), 8))
        if tn >= N:
            tn = N                      # full-batch block (== array dim is legal)
        grid = (pl.cdiv(N, tn),)        # no jnp.pad: ragged last block reads
                                        # row-local garbage, OOB output rows are
                                        # masked on writeback by Pallas.

        out = pl.pallas_call(
            _prepost_kernel,
            out_shape=jax.ShapeDtypeStruct((N, Kp), out_dtype),
            grid_spec=pltpu.PrefetchScalarGridSpec(
                num_scalar_prefetch=0,
                grid=grid,
                in_specs=[
                    # x tile: double-buffered stream over the batch.
                    pl.BlockSpec((tn, D), lambda i: (i, 0)),
                    # folded weight / bias: constant index_map -> resident,
                    # single VMEM buffer (no pointless second copy).
                    pl.BlockSpec((D, Kp), lambda i: (0, 0),
                                 pipeline_mode=pl.Buffered(1)),
                    pl.BlockSpec((1, Kp), lambda i: (0, 0),
                                 pipeline_mode=pl.Buffered(1)),
                ],
                out_specs=pl.BlockSpec((tn, Kp), lambda i: (i, 0)),
            ),
            compiler_params=pltpu.CompilerParams(
                dimension_semantics=("parallel",)),       # dual-TC on v7x
            cost_estimate=pl.CostEstimate(
                flops=2 * N * D * Kp,
                transcendentals=N * Kp,
                bytes_accessed=(N * D * x_itemsize + D * Kp * 2 + Kp * 4
                                + N * Kp * out_itemsize)),
        )(x_flat, w_pad, b_pad)
        return out[:, :K]

    return forward


if __name__ == "__main__":
    key = jax.random.PRNGKey(0)
    k_x, k_w, k_b, k_x2 = jax.random.split(key, 4)

    # Small shapes consistent with the module: NCHW image, 3 channels (RGB).
    N, C, H, W = 2, 3, 16, 16
    K = 16                      # num_classes of the synthetic inner model
    D = C * H * W

    x = jax.random.uniform(k_x, (N, C, H, W), dtype=jnp.float32)   # image in [0,1)
    weight = jax.random.normal(k_w, (D, K), dtype=jnp.float32) * 0.05
    bias = jax.random.normal(k_b, (K,), dtype=jnp.float32) * 0.1
    mean = [0.5, 0.5, 0.5]
    std = [0.5, 0.5, 0.5]

    forward = make_add_pre_post(weight, bias, mean, std, (H, W))

    def reference(xin):
        m = jnp.asarray(mean, jnp.float32).reshape(1, C, 1, 1)
        s = jnp.asarray(std, jnp.float32).reshape(1, C, 1, 1)
        xn = (xin - m) / s
        logit = xn.reshape(xin.shape[0], D) @ weight + bias
        return jax.nn.softmax(logit, axis=1)

    prob = jax.block_until_ready(forward(x))
    prob_ref = reference(x)
    assert prob.shape == (N, K)
    # bf16 MXU operands -> loosened (but safe) tolerances vs the f32 reference.
    assert jnp.allclose(prob, prob_ref, atol=1e-2, rtol=1e-2)
    assert jnp.allclose(jnp.sum(prob, axis=1), 1.0, atol=1e-3)

    # Second call exercises a 2-step grid with a ragged last batch tile
    # (N=20, tn=16): no jnp.pad, OOB rows masked on writeback.
    N2 = 20
    x2 = jax.random.uniform(k_x2, (N2, C, H, W), dtype=jnp.float32)
    prob2 = jax.block_until_ready(forward(x2))
    prob2_ref = reference(x2)
    assert prob2.shape == (N2, K)
    assert jnp.allclose(prob2, prob2_ref, atol=1e-2, rtol=1e-2)
    assert jnp.allclose(jnp.sum(prob2, axis=1), 1.0, atol=1e-3)

    print("KERNEL_OK")
</pallas_src>

<mosaic_0001>
module attributes {stable_mosaic.version = 11 : i64} {
  func.func @_prepost_kernel(%arg0: i32, %arg1: memref<2x768xf32, #tpu.memory_space<vmem>>, %arg2: memref<768x128xbf16, #tpu.memory_space<vmem>>, %arg3: memref<1x128xf32, #tpu.memory_space<vmem>>, %arg4: memref<2x128xf32, #tpu.memory_space<vmem>>) attributes {dimension_semantics = [#tpu.dimension_semantics<parallel>], iteration_bounds = array<i64: 1>, scalar_prefetch = 0 : i64, scratch_operands = 0 : i64, tpu.core_type = #tpu.core_type<tc>, window_params = [{transform_indices = @transform_0, window_bounds = array<i64: 2, 768>}, {pipeline_mode = #tpu.pipeline_mode<synchronous>, transform_indices = @transform_1, window_bounds = array<i64: 768, 128>}, {pipeline_mode = #tpu.pipeline_mode<synchronous>, transform_indices = @transform_2, window_bounds = array<i64: 1, 128>}, {transform_indices = @transform_3, window_bounds = array<i64: 2, 128>}]} {
    %c0 = arith.constant 0 : index
    %c0_0 = arith.constant 0 : index
    %0 = vector.load %arg1[%c0, %c0_0] : memref<2x768xf32, #tpu.memory_space<vmem>>, vector<2x768xf32>
    %1 = arith.truncf %0 : vector<2x768xf32> to vector<2x768xbf16>
    %c0_1 = arith.constant 0 : index
    %c0_2 = arith.constant 0 : index
    %2 = vector.load %arg2[%c0_1, %c0_2] : memref<768x128xbf16, #tpu.memory_space<vmem>>, vector<768x128xbf16>
    %cst = arith.constant dense<0.000000e+00> : vector<2x128xf32>
    %3 = tpu.matmul %1, %2, %cst {dimension_numbers = #tpu.dot_dimension_numbers<[1], [0], [0], [1], [0, 0, 1, 1], [], []>} : vector<2x768xbf16>, vector<768x128xbf16>, vector<2x128xf32> -> vector<2x128xf32>
    %c0_3 = arith.constant 0 : index
    %c0_4 = arith.constant 0 : index
    %4 = vector.load %arg3[%c0_3, %c0_4] : memref<1x128xf32, #tpu.memory_space<vmem>>, vector<1x128xf32>
    %5 = vector.broadcast %4 : vector<1x128xf32> to vector<2x128xf32>
    %6 = arith.addf %3, %5 : vector<2x128xf32>
    %cst_5 = arith.constant dense<0xFF800000> : vector<2xf32>
    %7 = vector.multi_reduction <maximumf>, %6, %cst_5 [1] : vector<2x128xf32> to vector<2xf32>
    %8 = vector.shape_cast %7 : vector<2xf32> to vector<2x1xf32>
    %9 = vector.broadcast %8 : vector<2x1xf32> to vector<2x128xf32>
    %10 = arith.subf %6, %9 : vector<2x128xf32>
    %11 = math.exp %10 : vector<2x128xf32>
    %cst_6 = arith.constant dense<0.000000e+00> : vector<2xf32>
    %12 = vector.multi_reduction <add>, %11, %cst_6 [1] : vector<2x128xf32> to vector<2xf32>
    %13 = vector.shape_cast %12 : vector<2xf32> to vector<2x1xf32>
    %14 = vector.broadcast %13 : vector<2x1xf32> to vector<2x128xf32>
    %15 = arith.divf %11, %14 : vector<2x128xf32>
    %c0_7 = arith.constant 0 : index
    %c0_8 = arith.constant 0 : index
    %16 = vector.load %arg4[%c0_7, %c0_8] : memref<2x128xf32, #tpu.memory_space<vmem>>, vector<2x128xf32>
    tpu.vector_store %arg4[%c0_7, %c0_8], %15 {strides = array<i32>} : memref<2x128xf32, #tpu.memory_space<vmem>>, vector<2x128xf32>,
    return
  }
  func.func @transform_0(%arg0: i32) -> (i32, i32) {
    %c0_i32 = arith.constant 0 : i32
    %c0_i32_0 = arith.constant 0 : i32
    return %arg0, %c0_i32 : i32, i32
  }
  func.func @transform_1(%arg0: i32) -> (i32, i32) {
    %c0_i32 = arith.constant 0 : i32
    %c0_i32_0 = arith.constant 0 : i32
    %c0_i32_1 = arith.constant 0 : i32
    return %c0_i32, %c0_i32_0 : i32, i32
  }
  func.func @transform_2(%arg0: i32) -> (i32, i32) {
    %c0_i32 = arith.constant 0 : i32
    %c0_i32_0 = arith.constant 0 : i32
    %c0_i32_1 = arith.constant 0 : i32
    return %c0_i32, %c0_i32_0 : i32, i32
  }
  func.func @transform_3(%arg0: i32) -> (i32, i32) {
    %c0_i32 = arith.constant 0 : i32
    %c0_i32_0 = arith.constant 0 : i32
    return %arg0, %c0_i32 : i32, i32
  }
}

</mosaic_0001>

<bundles_post_ra>
// kernel: forward.1
= control target key start
LH: loop header
LB: loop body
LE: loop exit
PB: predicated region body
PF: predicated region fallthrough
CT: control target
= control target key end

     0   :  { %8 = vsyncpa [#allocation3], 0  ;;  %s905_s0 = inlined_call_operand.vmem [shape: f32[2,768], index: 0, kind: input, shape index: {}]   ;;  %s906_s1 = inlined_call_operand.hbm [shape: bf16[768,128], index: 1, kind: input, shape index: {}]   ;;  %s907_s2 = inlined_call_operand.vmem [shape: f32[1,128], index: 2, kind: input, shape index: {}]   ;;  %s908_s3 = inlined_call_operand.hbm [shape: f32[2,128], index: 3, kind: output, shape index: {}]  }
   0x1   :  { %9 = vsyncpa [#allocation4], 0  ;;  %s16_s14 = sshll.u32 %s906_s1, 4  ;;  %s866_s15 = smov [#allocation2]   ;;  %s17_s14 = int_to_ptr.hbm [resolvable:$true] %s16_s14 }
   0x2   :  { %s18_s16 = sshll.u32 %s866_s15, 4  ;;  %s867_s17 = smov 64   ;;  %s19_s16 = int_to_ptr.vmem [resolvable:$true] %s18_s16 }
   0x3   :  { %s868_s18 = smov 4  }
   0x4   :  { %24 = dma.hbm_to_vmem [thread:$0]  %s17_s14, 6144, %s19_s16, [#allocation3], %s867_s17, %s867_s17, %s868_s18  }
   0x5   :  { %862 = dma.done.wait [#allocation3], 6144  }
   0x6   :  { %863 = vsyncadd [#allocation3], 4294961152  ;;  %v764_v0 = vld [vmem:[#allocation2 + $0x38] sm:$0xff]  ;;  %v763_v2 = vld [vmem:[#allocation2 + $0x30] sm:$0xff]  ;;  %vm522_vm0 = vcmask 1041408   ;;  %s555_s26 = sshll.u32 %s908_s3, 4  ;;  %s556_s26 = int_to_ptr.hbm [resolvable:$true] %s555_s26 }
   0x7   :  { %v772_v1 = vld [vmem:[#allocation2 + $0x78] sm:$0xff]  ;;  %444 = vmatpush.bf16.msra.mxu0 %v764_v0  ;;  %v771_v3 = vld [vmem:[#allocation2 + $0x70] sm:$0xff]  ;;  %v762_v8 = vld [vmem:[#allocation2 + $0x28] sm:$0xff] }
   0x8   :  { %457 = vmatpush.bf16.msra.mxu1 %v772_v1  ;;  %v780_v4 = vld [vmem:[#allocation2 + $0xb8] sm:$0xff]  ;;  %v779_v6 = vld [vmem:[#allocation2 + $0xb0] sm:$0xff]  ;;  %v770_v9 = vld [vmem:[#allocation2 + $0x68] sm:$0xff] }
   0x9   :  { %v788_v5 = vld [vmem:[#allocation2 + $0xf8] sm:$0xff]  ;;  %470 = vmatpush.bf16.msra.mxu2 %v780_v4  ;;  %v787_v7 = vld [vmem:[#allocation2 + $0xf0] sm:$0xff]  ;;  %v778_v10 = vld [vmem:[#allocation2 + $0xa8] sm:$0xff] }
   0xa   :  { %483 = vmatpush.bf16.msra.mxu3 %v788_v5  ;;  %v786_v11 = vld [vmem:[#allocation2 + $0xe8] sm:$0xff]  ;;  %v761_v12 = vld [vmem:[#allocation2 + $0x20] sm:$0xff]  ;;  %v31_v14 = vld [vmem:[%s905_s0] sm:$0xff] }
   0xb   :  { %445 = vmatpush.bf16.msra.mxu0 %v763_v2  ;;  %v769_v13 = vld [vmem:[#allocation2 + $0x60] sm:$0xff]  ;;  %35 = vst [vmem:[#allocation1] ss:$4 sm:$0xff] %v31_v14  ;;  %v760_v17 = vld [vmem:[#allocation2 + $0x18] sm:$0xff]  ;;  %v759_v21 = vld [vmem:[#allocation2 + $0x10] sm:$0xff] }
   0xc   :  { %458 = vmatpush.bf16.msra.mxu1 %v771_v3  ;;  %v777_v15 = vld [vmem:[#allocation2 + $0xa0] sm:$0xff]  ;;  %v768_v18 = vld [vmem:[#allocation2 + $0x58] sm:$0xff]  ;;  %v767_v22 = vld [vmem:[#allocation2 + $0x50] sm:$0xff] }
   0xd   :  { %471 = vmatpush.bf16.msra.mxu2 %v779_v6  ;;  %v785_v16 = vld [vmem:[#allocation2 + $0xe0] sm:$0xff]  ;;  %v776_v19 = vld [vmem:[#allocation2 + $0x98] sm:$0xff]  ;;  %v775_v23 = vld [vmem:[#allocation2 + $0x90] sm:$0xff] }
   0xe   :  { %484 = vmatpush.bf16.msra.mxu3 %v787_v7  ;;  %v784_v20 = vld [vmem:[#allocation2 + $0xd8] sm:$0xff]  ;;  %v783_v24 = vld [vmem:[#allocation2 + $0xd0] sm:$0xff]  ;;  %v32_v25 = vld [vmem:[%s905_s0 + $0x8] sm:$0xf] }
   0xf   :  { %446 = vmatpush.bf16.msra.mxu0 %v762_v8  ;;  %v758_v26 = vld [vmem:[#allocation2 + $0x8] sm:$0xff]  ;;  %37 = vst [vmem:[#allocation1 + $0x20] ss:$4 sm:$0xff] %v32_v25  ;;  %v757_v29 = vld [vmem:[#allocation2] sm:$0xff]  ;;  %v796_v34 = vld [vmem:[#allocation2 + $0x138] sm:$0xff] }
  0x10   :  { %459 = vmatpush.bf16.msra.mxu1 %v770_v9  ;;  %v766_v27 = vld [vmem:[#allocation2 + $0x48] sm:$0xff]  ;;  %v765_v30 = vld [vmem:[#allocation2 + $0x40] sm:$0xff]  ;;  %v804_v35 = vld [vmem:[#allocation2 + $0x178] sm:$0xff] }
  0x11   :  { %472 = vmatpush.bf16.msra.mxu2 %v778_v10  ;;  %v774_v28 = vld [vmem:[#allocation2 + $0x88] sm:$0xff]  ;;  %v773_v36 = vld [vmem:[#allocation2 + $0x80] sm:$0xff]  ;;  %v795_v42 = vld [vmem:[#allocation2 + $0x130] sm:$0xff] }
  0x12   :  { %485 = vmatpush.bf16.msra.mxu3 %v786_v11  ;;  %v782_v31 = vld [vmem:[#allocation2 + $0xc8] sm:$0xff]  ;;  %v38_v32 = vld.sshfl [vmem:[#allocation1] sm:$0xff pattern:$0x73625140]  ;;  %v781_v40 = vld [vmem:[#allocation2 + $0xc0] sm:$0xff] }
  0x13   :  { %447 = vmatpush.bf16.msra.mxu0 %v761_v12  ;;  %v39_v33 = vld.sshfl [vmem:[#allocation1 + $0x8] sm:$0xff pattern:$0x73625140]  ;;  %v50_v37 = vpack.c.bf16 %v38_v32, %v38_v32  ;;  %v40_v39 = vld.sshfl [vmem:[#allocation1 + $0x10] sm:$0xff pattern:$0x73625140] }
  0x14   :  { %460 = vmatpush.bf16.msra.mxu1 %v769_v13  ;;  %v51_v38 = vpack.c.bf16 %v39_v33, %v39_v33  ;;  %v41_v41 = vld.sshfl [vmem:[#allocation1 + $0x18] sm:$0xff pattern:$0x73625140]  ;;  %v52_v44 = vpack.c.bf16 %v40_v39, %v40_v39  ;;  %v794_v46 = vld [vmem:[#allocation2 + $0x128] sm:$0xff]  ;;  %v793_v48 = vld [vmem:[#allocation2 + $0x120] sm:$0xff] }
  0x15   :  { %473 = vmatpush.bf16.msra.mxu2 %v777_v15  ;;  %v803_v43 = vld [vmem:[#allocation2 + $0x170] sm:$0xff]  ;;  %v53_v45 = vpack.c.bf16 %v41_v41, %v41_v41  ;;  %v802_v47 = vld [vmem:[#allocation2 + $0x168] sm:$0xff]  ;;  %v801_v49 = vld [vmem:[#allocation2 + $0x160] sm:$0xff] }
  0x16   :  { %486 = vmatpush.bf16.msra.mxu3 %v785_v16  ;;  %v792_v50 = vld [vmem:[#allocation2 + $0x118] sm:$0xff]  ;;  %v791_v52 = vld [vmem:[#allocation2 + $0x110] sm:$0xff]  ;;  %v790_v54 = vld [vmem:[#allocation2 + $0x108] sm:$0xff] }
  0x17   :  { %448 = vmatpush.bf16.msra.mxu0 %v760_v17  ;;  %v800_v51 = vld [vmem:[#allocation2 + $0x158] sm:$0xff]  ;;  %v799_v53 = vld [vmem:[#allocation2 + $0x150] sm:$0xff]  ;;  %v798_v55 = vld [vmem:[#allocation2 + $0x148] sm:$0xff] }
  0x18   :  { %461 = vmatpush.bf16.msra.mxu1 %v768_v18  ;;  %v789_v56 = vld [vmem:[#allocation2 + $0x100] sm:$0xff]  ;;  %v42_v58 = vld.sshfl [vmem:[#allocation1 + $0x20] sm:$0xff pattern:$0x73625140] }
  0x19   :  { %474 = vmatpush.bf16.msra.mxu2 %v776_v19  ;;  %v797_v57 = vld [vmem:[#allocation2 + $0x140] sm:$0xff]  ;;  %v54_v60 = vpack.c.bf16 %v42_v58, %v42_v58  ;;  %v809_v4 = vld [vmem:[%s907_s2] ss:$0 sm:$0xff]  ;;  %s869_s2 = smov [#allocation5]  }
  0x1a   :  { %487 = vmatpush.bf16.msra.mxu3 %v784_v20  ;;  %v43_v59 = vld.sshfl [vmem:[#allocation1 + $0x28] sm:$0xff pattern:$0x73625140]  ;;  %s553_s23 = sshll.u32 %s869_s2, 4  ;;  %s554_s23 = int_to_ptr.vmem [resolvable:$true] %s553_s23 }
  0x1b   :  { %449 = vmatpush.bf16.msra.mxu0 %v759_v21  ;;  %v55_v61 = vpack.c.bf16 %v43_v59, %v43_v59 }
  0x1c   :  { %462 = vmatpush.bf16.msra.mxu1 %v767_v22 }
  0x1d   :  { %475 = vmatpush.bf16.msra.mxu2 %v775_v23 }
  0x1e   :  { %488 = vmatpush.bf16.msra.mxu3 %v783_v24 }
  0x1f   :  { %450 = vmatpush.bf16.msra.mxu0 %v758_v26 }
  0x20   :  { %463 = vmatpush.bf16.msra.mxu1 %v766_v27 }
  0x21   :  { %476 = vmatpush.bf16.msra.mxu2 %v774_v28 }
  0x22   :  { %489 = vmatpush.bf16.msra.mxu3 %v782_v31 }
  0x23   :  { %451 = vmatpush.bf16.msra.mxu0 %v757_v29 }
  0x24   :  { %464 = vmatpush.bf16.msra.mxu1 %v765_v30 }
  0x25   :  { %477 = vmatpush.bf16.msra.mxu2 %v773_v36 }
  0x26   :  { %452 = vmatmul.bf16.vlgmr.msra.gmra.mxu0 %v50_v37  ;;  %490 = vmatpush.bf16.msra.mxu3 %v781_v40 }
  0x27   :  { %496 = vmatpush.bf16.msrb.mxu0 %v796_v34  ;;  %465 = vmatmul.bf16.vlgmr.msra.gmra.mxu1 %v51_v38 }
  0x28   :  { %509 = vmatpush.bf16.msrb.mxu1 %v804_v35  ;;  %478 = vmatmul.bf16.vlgmr.msra.gmra.mxu2 %v52_v44 }
  0x29   :  { %491 = vmatmul.bf16.vlgmr.msra.gmra.mxu3 %v53_v45 }
  0x2b   :  { %497 = vmatpush.bf16.msrb.mxu0 %v795_v42 }
  0x2c   :  { %510 = vmatpush.bf16.msrb.mxu1 %v803_v43 }
  0x2f   :  { %498 = vmatpush.bf16.msrb.mxu0 %v794_v46 }
  0x30   :  { %511 = vmatpush.bf16.msrb.mxu1 %v802_v47 }
  0x33   :  { %499 = vmatpush.bf16.msrb.mxu0 %v793_v48 }
  0x34   :  { %512 = vmatpush.bf16.msrb.mxu1 %v801_v49 }
  0x37   :  { %500 = vmatpush.bf16.msrb.mxu0 %v792_v50 }
  0x38   :  { %513 = vmatpush.bf16.msrb.mxu1 %v800_v51 }
  0x3b   :  { %501 = vmatpush.bf16.msrb.mxu0 %v791_v52 }
  0x3c   :  { %514 = vmatpush.bf16.msrb.mxu1 %v799_v53 }
  0x3f   :  { %502 = vmatpush.bf16.msrb.mxu0 %v790_v54 }
  0x40   :  { %515 = vmatpush.bf16.msrb.mxu1 %v798_v55 }
  0x43   :  { %503 = vmatpush.bf16.msrb.mxu0 %v789_v56 }
  0x44   :  { %516 = vmatpush.bf16.msrb.mxu1 %v797_v57 }
  0x46   :  { %504 = vmatmul.bf16.vlgmr.msrb.gmra.mxu0 %v54_v60 }
  0x47   :  { %517 = vmatmul.bf16.vlgmr.msrb.gmra.mxu1 %v55_v61 }
  0xa3   :  { %v453_v62 = vpop.f32.mrf.mxu0 }
  0xa4   :  { %v466_v63 = vpop.f32.mrf.mxu1  ;;  %v454_v5 = vadd.f32 %v809_v4, %v453_v62 }
  0xa6   :  { %v467_v8 = vadd.f32 %v466_v63, %v454_v5 }
  0xab   :  { %v455_v0 = vpop.f32.mrf.mxu0  ;;  %v479_v2 = vpop.f32.mrf.mxu2 }
  0xac   :  { %v468_v1 = vpop.f32.mrf.mxu1  ;;  %v492_v3 = vpop.f32.mrf.mxu3  ;;  %v480_v9 = vadd.f32 %v479_v2, %v467_v8 }
  0xae   :  { %v493_v10 = vadd.f32 %v492_v3, %v480_v9 }
  0xb3   :  { %v481_v6 = vpop.f32.mrf.mxu2 }
  0xb4   :  { %v494_v7 = vpop.f32.mrf.mxu3 }
  0xc3   :  { %v505_v11 = vpop.f32.mrf.mxu0 }
  0xc4   :  { %v518_v12 = vpop.f32.mrf.mxu1  ;;  %v506_v13 = vadd.f32 %v505_v11, %v493_v10 }
  0xc6   :  { %v519_v14 = vadd.f32 %v518_v12, %v506_v13 }
  0xc8   :  { %v523_v15 = vsel %vm522_vm0, %v519_v14, -inf }
  0xc9   :  { %524 = vmax.xlane.f32.xlu0 %v523_v15 }
  0xcb   :  { %v507_v16 = vpop.f32.mrf.mxu0 }
  0xcc   :  { %v520_v17 = vpop.f32.mrf.mxu1 }
 0x13c   :  { %v525_v18 = vpop.xlane.xlu0 %524 }
 0x13d   :  { %v526_v19 = vsub.f32 %v519_v14, %v525_v18 }
 0x13f   :  { %v527_v20 = vmul.f32 1.442695, %v526_v19 }
 0x141   :  { %810 = vpow2.f32 %v527_v20 }
 0x147   :  { %v811_v21 = vpop.eup %810 }
 0x148   :  { %v529_v22 = vsel %vm522_vm0, %v811_v21, 0.0 }
 0x149   :  { %530 = vadd.xlane.f32.xlu0 %v529_v22 }
 0x1bc   :  { %v531_v23 = vpop.xlane.xlu0 %530 }
 0x1bd   :  { %812 = vrcp.f32 %v531_v23  ;;  %v543_v27 = vand.u32 2147483648, %v531_v23  ;;  %v541_v29 = vand.u32 2147483647, %v531_v23  ;;  %vm537_vm2 = vweird.f32 %v531_v23 }
 0x1bf   :  { %v544_v31 = vor.u32 1.1754944e-38, %v543_v27  ;;  %vm542_vm4 = vcmp.eq.f32.partialorder %v541_v29, 8.507059e+37 }
 0x1c3   :  { %v813_v24 = vpop.eup %812 }
 0x1c4   :  { %v533_v25 = vmul.f32 %v813_v24, %v531_v23  ;;  %vm538_vm1 = vweird.f32 %v813_v24 }
 0x1c5   :  { %vm539_vm3 = vmor %vm537_vm2, %vm538_vm1 }
 0x1c6   :  { %v534_v26 = vsub.f32 1.0, %v533_v25 }
 0x1c8   :  { %v535_v28 = vmul.f32 %v813_v24, %v534_v26 }
 0x1ca   :  { %v536_v30 = vadd.f32 %v813_v24, %v535_v28 }
 0x1cc   :  { %v540_v32 = vsel %vm539_vm3, %v813_v24, %v536_v30 }
 0x1cd   :  { %v545_v33 = vsel %vm542_vm4, %v544_v31, %v540_v32 }
 0x1ce   :  { %v546_v34 = vmul.f32 %v811_v21, %v545_v33 }
 0x1d0   :  { %547 = vst [vmem:[#allocation5] sm:$0x3] %v546_v34 }
 0x1d1   :  { %558 = dma.vmem_to_hbm [thread:$0]  %s554_s23, 32, %s556_s26, [#allocation4]  }
 0x1d2   :  { %864 = dma.done.wait [#allocation4], 32  }
 0x1d3   :  { %865 = vsyncadd [#allocation4], 4294967264 }
 0x1d4   :  { %563 = vsyncpa [#allocation3], 1 }
 0x1d5   :  { %564 = vsyncpa [#allocation4], 1 }

</bundles_post_ra>
